<compile_context>
chip_gen: v5e
topology: v5e:2x2
jax: 0.10.0
libtpu: 0.0.40
codegen_flags: <defaults>
</compile_context>

<pallas_src>
import functools

import jax
import jax.numpy as jnp
from jax import lax
from jax.experimental import pallas as pl
from jax.experimental.pallas import tpu as pltpu

LANE = 128
SUBLANE = 8


def _round_up(n, m):
    return ((n + m - 1) // m) * m


def dqn_kernel(x_ref, w_ref, b_ref, out_ref, *, state_size, s_pad, feat_pad,
               action_size, out_cols, compute_argmax):
    """One grid step: full 3-layer MLP on a (tb, state_size) tile of the batch.

    w_ref packed slab rows: [0, state_size)              -> W1 (state_size, feat_pad)
                            [s_pad, s_pad+feat_pad)      -> W2 (feat_pad, feat_pad)
                            [s_pad+feat_pad, +2*feat_pad)-> W3 (feat_pad, feat_pad)
    b_ref: (24, feat_pad) f32 slab, b1/b2/b3 at sublane-aligned rows 0/8/16.
    out_ref: (tb, out_cols); cols [0, action_size) hold Q, and when
    compute_argmax col action_size holds the greedy action as a float.
    """
    w_dt = w_ref.dtype
    x = x_ref[...].astype(w_dt)
    w1 = w_ref[0:state_size, :]
    w2 = w_ref[s_pad:s_pad + feat_pad, :]
    w3 = w_ref[s_pad + feat_pad:s_pad + 2 * feat_pad, :]
    b1 = b_ref[0:1, :]
    b2 = b_ref[SUBLANE:SUBLANE + 1, :]
    b3 = b_ref[2 * SUBLANE:2 * SUBLANE + 1, :]

    h = jnp.dot(x, w1, preferred_element_type=jnp.float32) + b1
    h = jnp.maximum(h, 0.0).astype(w_dt)
    h = jnp.dot(h, w2, preferred_element_type=jnp.float32) + b2
    h = jnp.maximum(h, 0.0).astype(w_dt)
    q = jnp.dot(h, w3, preferred_element_type=jnp.float32) + b3   # (tb, feat_pad) f32

    out = q[:, :out_cols]
    if compute_argmax:
        # Greedy action over the real action columns only (first max wins).
        col = lax.broadcasted_iota(jnp.int32, q.shape, 1)
        valid = col < action_size
        qv = jnp.where(valid, q, -jnp.inf)
        qmax = jnp.max(qv, axis=-1, keepdims=True)
        idx = jnp.min(jnp.where(qv == qmax, col, feat_pad), axis=-1, keepdims=True)
        idx = jnp.minimum(idx, action_size - 1)        # guard (e.g. all-NaN row)
        ocol = lax.broadcasted_iota(jnp.int32, out.shape, 1)
        out = jnp.where(ocol == action_size, idx.astype(jnp.float32), out)
    out_ref[...] = out.astype(out_ref.dtype)


def pack_dqn_params(params, stream_dtype=jnp.float32):
    """Pack PyTorch-layout (W stored as (in, out)) params into two lane-padded slabs."""
    w1, b1 = params["w1"], params["b1"]
    w2, b2 = params["w2"], params["b2"]
    w3, b3 = params["w3"], params["b3"]
    state_size, hidden = w1.shape
    action_size = w3.shape[1]

    s_pad = _round_up(state_size, SUBLANE)
    feat_pad = _round_up(max(hidden, action_size), LANE)

    w_slab = jnp.zeros((s_pad + 2 * feat_pad, feat_pad), jnp.float32)
    w_slab = w_slab.at[:state_size, :hidden].set(w1)
    w_slab = w_slab.at[s_pad:s_pad + hidden, :hidden].set(w2)
    w_slab = w_slab.at[s_pad + feat_pad:s_pad + feat_pad + hidden, :action_size].set(w3)

    # Biases stay f32 (added to the f32 accumulator), one bias per aligned sublane row.
    b_slab = jnp.zeros((3 * SUBLANE, feat_pad), jnp.float32)
    b_slab = b_slab.at[0, :hidden].set(b1.reshape(-1))
    b_slab = b_slab.at[SUBLANE, :hidden].set(b2.reshape(-1))
    b_slab = b_slab.at[2 * SUBLANE, :action_size].set(b3.reshape(-1))

    meta = dict(state_size=state_size, hidden=hidden, action_size=action_size,
                s_pad=s_pad, feat_pad=feat_pad)
    return w_slab.astype(stream_dtype), b_slab, meta


def dqn_forward(x, packed, *, tb_max=1024, return_argmax=False, interpret=False):
    """x: (B, state_size). packed: output of pack_dqn_params.

    Returns Q (B, action_size) f32, and optionally the greedy actions (B,) int32.
    """
    w_slab, b_slab, meta = packed
    B, state_size = x.shape
    assert state_size == meta["state_size"]
    s_pad = meta["s_pad"]
    feat_pad = meta["feat_pad"]
    action_size = meta["action_size"]

    out_cols = action_size + 1 if return_argmax else action_size
    out_dtype = jnp.float32

    # Batch tile: multiple of 8, as large as useful (sweepable via tb_max).
    tb = min(_round_up(tb_max, SUBLANE), _round_up(B, SUBLANE))
    num_steps = pl.cdiv(B, tb)
    if num_steps == 1 and B > SUBLANE:
        # Ensure >=2 grid steps so the "parallel" axis shards across both
        # TensorCores on v7x (harmless on v5e/v6e single-TC parts).
        tb = _round_up(pl.cdiv(B, 2), SUBLANE)
        num_steps = pl.cdiv(B, tb)

    if x.dtype != w_slab.dtype:
        x = x.astype(w_slab.dtype)

    kernel = functools.partial(
        dqn_kernel, state_size=state_size, s_pad=s_pad, feat_pad=feat_pad,
        action_size=action_size, out_cols=out_cols, compute_argmax=return_argmax)

    flops = 2 * B * (state_size * feat_pad + 2 * feat_pad * feat_pad)
    bytes_accessed = (B * state_size * jnp.dtype(x.dtype).itemsize
                      + B * out_cols * jnp.dtype(out_dtype).itemsize
                      + int(w_slab.size) * jnp.dtype(w_slab.dtype).itemsize
                      + int(b_slab.size) * 4)

    out = pl.pallas_call(
        kernel,
        out_shape=jax.ShapeDtypeStruct((B, out_cols), out_dtype),
        grid=(num_steps,),
        in_specs=[
            # x streams per grid step (double-buffered by the pipeline).
            pl.BlockSpec((tb, state_size), lambda i: (i, 0)),
            # Weight / bias slabs: constant block index -> resident in VMEM.
            pl.BlockSpec(w_slab.shape, lambda i: (0, 0)),
            pl.BlockSpec(b_slab.shape, lambda i: (0, 0)),
        ],
        out_specs=pl.BlockSpec((tb, out_cols), lambda i: (i, 0)),
        compiler_params=pltpu.CompilerParams(dimension_semantics=("parallel",)),
        cost_estimate=pl.CostEstimate(flops=flops, transcendentals=0,
                                      bytes_accessed=bytes_accessed),
        interpret=interpret,
    )(x, w_slab, b_slab)

    if return_argmax:
        q = out[:, :action_size]
        act = out[:, action_size].astype(jnp.int32)
        return q, act
    return out


def init_dqn_params(key, state_size, action_size, hidden=24):
    """Deterministic init mimicking PyTorch's default Linear init
    (uniform(-1/sqrt(fan_in), 1/sqrt(fan_in))). Weights stored as (in, out)."""
    keys = jax.random.split(key, 6)

    def linear(kw, kb, fan_in, fan_out):
        bound = 1.0 / jnp.sqrt(jnp.float32(fan_in))
        w = jax.random.uniform(kw, (fan_in, fan_out), jnp.float32, -bound, bound)
        b = jax.random.uniform(kb, (1, fan_out), jnp.float32, -bound, bound)
        return w, b

    w1, b1 = linear(keys[0], keys[1], state_size, hidden)
    w2, b2 = linear(keys[2], keys[3], hidden, hidden)
    w3, b3 = linear(keys[4], keys[5], hidden, action_size)
    return {"w1": w1, "b1": b1, "w2": w2, "b2": b2, "w3": w3, "b3": b3}


def dqn_reference(x, params):
    """Pure-JAX reference of the PyTorch forward, for verification."""
    h1 = jnp.maximum(x @ params["w1"] + params["b1"], 0.0)
    h2 = jnp.maximum(h1 @ params["w2"] + params["b2"], 0.0)
    return h2 @ params["w3"] + params["b3"]


if __name__ == "__main__":
    key = jax.random.PRNGKey(0)
    k_params, k_x, k_x2, k_x3 = jax.random.split(key, 4)

    batch = 2
    state_size = 8
    action_size = 4

    params = init_dqn_params(k_params, state_size, action_size)
    packed = pack_dqn_params(params)  # f32 stream by default

    # Acting path: tiny batch, fused greedy-action output packed into the Q block.
    x = jax.random.normal(k_x, (batch, state_size), jnp.float32)
    q, act = dqn_forward(x, packed, return_argmax=True)
    q = jax.block_until_ready(q)
    q_ref = dqn_reference(x, params)
    assert q.shape == (batch, action_size)
    assert jnp.allclose(q, q_ref, atol=1e-5, rtol=1e-5)
    assert jnp.array_equal(act, jnp.argmax(q_ref, axis=-1))

    # Training-style path: larger non-multiple batch -> >=2 pipelined grid steps,
    # ragged last tile, no argmax work, narrow lane Q writeback.
    x2 = jax.random.normal(k_x2, (300, state_size), jnp.float32)
    q2 = jax.block_until_ready(dqn_forward(x2, packed))
    q2_ref = dqn_reference(x2, params)
    assert q2.shape == (300, action_size)
    assert jnp.allclose(q2, q2_ref, atol=1e-4, rtol=1e-4)

    # bf16 streaming path (weights/x bf16, f32 accumulation) - loose tolerance.
    packed_bf16 = pack_dqn_params(params, stream_dtype=jnp.bfloat16)
    x3 = jax.random.normal(k_x3, (64, state_size), jnp.float32)
    q3 = jax.block_until_ready(dqn_forward(x3, packed_bf16))
    q3_ref = dqn_reference(x3, params)
    assert q3.shape == (64, action_size)
    assert jnp.allclose(q3, q3_ref, atol=1e-1, rtol=1e-1)

    print("KERNEL_OK")
</pallas_src>

<mosaic_0001>
module attributes {stable_mosaic.version = 11 : i64} {
  func.func @dqn_kernel(%arg0: i32, %arg1: memref<8x8xf32, #tpu.memory_space<vmem>>, %arg2: memref<264x128xf32, #tpu.memory_space<vmem>>, %arg3: memref<24x128xf32, #tpu.memory_space<vmem>>, %arg4: memref<8x5xf32, #tpu.memory_space<vmem>>) attributes {dimension_semantics = [#tpu.dimension_semantics<parallel>], iteration_bounds = array<i64: 1>, scalar_prefetch = 0 : i64, scratch_operands = 0 : i64, tpu.core_type = #tpu.core_type<tc>, window_params = [{transform_indices = @transform_0, window_bounds = array<i64: 8, 8>}, {pipeline_mode = #tpu.pipeline_mode<synchronous>, transform_indices = @transform_1, window_bounds = array<i64: 264, 128>}, {pipeline_mode = #tpu.pipeline_mode<synchronous>, transform_indices = @transform_2, window_bounds = array<i64: 24, 128>}, {transform_indices = @transform_3, window_bounds = array<i64: 8, 5>}]} {
    %c0 = arith.constant 0 : index
    %c0_0 = arith.constant 0 : index
    %0 = vector.load %arg1[%c0, %c0_0] : memref<8x8xf32, #tpu.memory_space<vmem>>, vector<8x8xf32>
    %c0_1 = arith.constant 0 : index
    %c0_2 = arith.constant 0 : index
    %1 = vector.load %arg2[%c0_1, %c0_2] : memref<264x128xf32, #tpu.memory_space<vmem>>, vector<8x128xf32>
    %c8 = arith.constant 8 : index
    %c0_3 = arith.constant 0 : index
    %2 = vector.load %arg2[%c8, %c0_3] : memref<264x128xf32, #tpu.memory_space<vmem>>, vector<128x128xf32>
    %c136 = arith.constant 136 : index
    %c0_4 = arith.constant 0 : index
    %3 = vector.load %arg2[%c136, %c0_4] : memref<264x128xf32, #tpu.memory_space<vmem>>, vector<128x128xf32>
    %c0_5 = arith.constant 0 : index
    %c0_6 = arith.constant 0 : index
    %4 = vector.load %arg3[%c0_5, %c0_6] : memref<24x128xf32, #tpu.memory_space<vmem>>, vector<1x128xf32>
    %c8_7 = arith.constant 8 : index
    %c0_8 = arith.constant 0 : index
    %5 = vector.load %arg3[%c8_7, %c0_8] : memref<24x128xf32, #tpu.memory_space<vmem>>, vector<1x128xf32>
    %c16 = arith.constant 16 : index
    %c0_9 = arith.constant 0 : index
    %6 = vector.load %arg3[%c16, %c0_9] : memref<24x128xf32, #tpu.memory_space<vmem>>, vector<1x128xf32>
    %cst = arith.constant dense<0.000000e+00> : vector<8x128xf32>
    %7 = tpu.matmul %0, %1, %cst {dimension_numbers = #tpu.dot_dimension_numbers<[1], [0], [0], [1], [0, 0, 1, 1], [], []>} : vector<8x8xf32>, vector<8x128xf32>, vector<8x128xf32> -> vector<8x128xf32>
    %8 = vector.broadcast %4 : vector<1x128xf32> to vector<8x128xf32>
    %9 = arith.addf %7, %8 : vector<8x128xf32>
    %cst_10 = arith.constant 0.000000e+00 : f32
    %10 = vector.broadcast %cst_10 : f32 to vector<8x128xf32>
    %11 = arith.maximumf %9, %10 : vector<8x128xf32>
    %cst_11 = arith.constant dense<0.000000e+00> : vector<8x128xf32>
    %12 = tpu.matmul %11, %2, %cst_11 {dimension_numbers = #tpu.dot_dimension_numbers<[1], [0], [0], [1], [0, 0, 1, 1], [], []>} : vector<8x128xf32>, vector<128x128xf32>, vector<8x128xf32> -> vector<8x128xf32>
    %13 = vector.broadcast %5 : vector<1x128xf32> to vector<8x128xf32>
    %14 = arith.addf %12, %13 : vector<8x128xf32>
    %cst_12 = arith.constant 0.000000e+00 : f32
    %15 = vector.broadcast %cst_12 : f32 to vector<8x128xf32>
    %16 = arith.maximumf %14, %15 : vector<8x128xf32>
    %cst_13 = arith.constant dense<0.000000e+00> : vector<8x128xf32>
    %17 = tpu.matmul %16, %3, %cst_13 {dimension_numbers = #tpu.dot_dimension_numbers<[1], [0], [0], [1], [0, 0, 1, 1], [], []>} : vector<8x128xf32>, vector<128x128xf32>, vector<8x128xf32> -> vector<8x128xf32>
    %18 = vector.broadcast %6 : vector<1x128xf32> to vector<8x128xf32>
    %19 = arith.addf %17, %18 : vector<8x128xf32>
    %20 = vector.extract_strided_slice %19 {offsets = [0, 0], sizes = [8, 5], strides = [1, 1]} : vector<8x128xf32> to vector<8x5xf32>
    %21 = tpu.iota {dimensions = array<i32: 1>} : vector<8x128xi32>
    %c4_i32 = arith.constant 4 : i32
    %22 = vector.broadcast %c4_i32 : i32 to vector<8x128xi32>
    %23 = arith.cmpi slt, %21, %22 : vector<8x128xi32>
    %cst_14 = arith.constant 0xFF800000 : f32
    %24 = vector.broadcast %cst_14 : f32 to vector<8x128xf32>
    %25 = arith.select %23, %19, %24 : vector<8x128xi1>, vector<8x128xf32>
    %cst_15 = arith.constant dense<0xFF800000> : vector<8xf32>
    %26 = vector.multi_reduction <maximumf>, %25, %cst_15 [1] : vector<8x128xf32> to vector<8xf32>
    %27 = vector.shape_cast %26 : vector<8xf32> to vector<8x1xf32>
    %28 = vector.broadcast %27 : vector<8x1xf32> to vector<8x128xf32>
    %29 = arith.cmpf oeq, %25, %28 : vector<8x128xf32>
    %c128_i32 = arith.constant 128 : i32
    %30 = vector.broadcast %c128_i32 : i32 to vector<8x128xi32>
    %31 = arith.select %29, %21, %30 : vector<8x128xi1>, vector<8x128xi32>
    %cst_16 = arith.constant dense<2147483647> : vector<8xi32>
    %32 = vector.multi_reduction <minsi>, %31, %cst_16 [1] : vector<8x128xi32> to vector<8xi32>
    %33 = vector.shape_cast %32 : vector<8xi32> to vector<8x1xi32>
    %c3_i32 = arith.constant 3 : i32
    %34 = vector.broadcast %c3_i32 : i32 to vector<8x1xi32>
    %35 = arith.minsi %33, %34 : vector<8x1xi32>
    %36 = tpu.iota {dimensions = array<i32: 1>} : vector<8x5xi32>
    %c4_i32_17 = arith.constant 4 : i32
    %37 = vector.broadcast %c4_i32_17 : i32 to vector<8x5xi32>
    %38 = arith.cmpi eq, %36, %37 : vector<8x5xi32>
    %39 = arith.sitofp %35 : vector<8x1xi32> to vector<8x1xf32>
    %40 = vector.shape_cast %39 : vector<8x1xf32> to vector<8x1xf32>
    %41 = vector.broadcast %40 : vector<8x1xf32> to vector<8x5xf32>
    %42 = arith.select %38, %41, %20 : vector<8x5xi1>, vector<8x5xf32>
    %c0_18 = arith.constant 0 : index
    %c0_19 = arith.constant 0 : index
    %43 = vector.load %arg4[%c0_18, %c0_19] : memref<8x5xf32, #tpu.memory_space<vmem>>, vector<8x5xf32>
    tpu.vector_store %arg4[%c0_18, %c0_19], %42 {strides = array<i32>} : memref<8x5xf32, #tpu.memory_space<vmem>>, vector<8x5xf32>,
    return
  }
  func.func @transform_0(%arg0: i32) -> (i32, i32) {
    %c0_i32 = arith.constant 0 : i32
    %c0_i32_0 = arith.constant 0 : i32
    return %arg0, %c0_i32 : i32, i32
  }
  func.func @transform_1(%arg0: i32) -> (i32, i32) {
    %c0_i32 = arith.constant 0 : i32
    %c0_i32_0 = arith.constant 0 : i32
    %c0_i32_1 = arith.constant 0 : i32
    return %c0_i32, %c0_i32_0 : i32, i32
  }
  func.func @transform_2(%arg0: i32) -> (i32, i32) {
    %c0_i32 = arith.constant 0 : i32
    %c0_i32_0 = arith.constant 0 : i32
    %c0_i32_1 = arith.constant 0 : i32
    return %c0_i32, %c0_i32_0 : i32, i32
  }
  func.func @transform_3(%arg0: i32) -> (i32, i32) {
    %c0_i32 = arith.constant 0 : i32
    %c0_i32_0 = arith.constant 0 : i32
    return %arg0, %c0_i32 : i32, i32
  }
}

</mosaic_0001>

<bundles_post_ra>
// kernel: tpu_custom_call.1
= control target key start
LH: loop header
LB: loop body
LE: loop exit
PB: predicated region body
PF: predicated region fallthrough
CT: control target
= control target key end

     0   :  { %8 = vsyncpa [#allocation3], 0  ;;  %s377_s0 = inlined_call_operand.hbm [shape: f32[2,8], index: 0, kind: input, shape index: {}]   ;;  %s378_s1 = inlined_call_operand.hbm [shape: f32[264,128], index: 1, kind: input, shape index: {}]   ;;  %s379_s2 = inlined_call_operand.hbm [shape: f32[24,128], index: 2, kind: input, shape index: {}]   ;;  %s380_s3 = inlined_call_operand.hbm [shape: f32[2,5], index: 3, kind: output, shape index: {}]  }
   0x1   :  { %9 = vsyncpa [#allocation6], 0 }
   0x2   :  { %10 = vsyncpa [#allocation4], 0  ;;  %s28_s14 = sshll.u32 %s378_s1, 4  ;;  %s29_s14 = int_to_ptr.hbm [resolvable:$true] %s28_s14 }
   0x3   :  { %14 = vsyncadd [#allocation3], 96  ;;  %s331_s15 = smov [#allocation5]   ;;  %s15_s19 = sshll.u32 %s377_s0, 4  ;;  %s16_s19 = int_to_ptr.hbm [resolvable:$true] %s15_s19 }
   0x4   :  { %s30_s16 = sshll.u32 %s331_s15, 4  ;;  %s332_s20 = smov 128   ;;  %s31_s16 = int_to_ptr.vmem [resolvable:$true] %s30_s16 }
   0x5   :  { %s333_s21 = smov 8   ;;  %s334_s22 = smov [#allocation2]  }
   0x6   :  { %36 = dma.hbm_to_vmem [thread:$0]  %s29_s14, 4224, %s31_s16, [#allocation6], %s332_s20, %s332_s20, %s333_s21  }
   0x7   :  { %s17_s23 = sshll.u32 %s334_s22, 4  ;;  %s335_s24 = smov 32   ;;  %s18_s23 = int_to_ptr.vmem [resolvable:$true] %s17_s23 }
   0x8   :  { %s336_s25 = smov 2   ;;  %s41_s27 = sshll.u32 %s379_s2, 4  ;;  %s42_s27 = int_to_ptr.hbm [resolvable:$true] %s41_s27 }
   0x9   :  { %23 = dma.hbm_to_vmem [thread:$0]  %s16_s19, 32, %s18_s23, [#allocation3], %s335_s24, %s335_s24, %s336_s25  }
   0xa   :  { %s337_s28 = smov [#allocation7]  }
   0xb   :  { %s43_s0 = sshll.u32 %s337_s28, 4  ;;  %s44_s0 = int_to_ptr.vmem [resolvable:$true] %s43_s0 }
   0xc   :  { %49 = dma.hbm_to_vmem [thread:$0]  %s42_s27, 384, %s44_s0, [#allocation6], %s332_s20, %s332_s20, %s333_s21  }
   0xd   :  { %325 = dma.done.wait [#allocation3], 128  }
   0xe   :  { %326 = vsyncadd [#allocation3], 4294967168 }
   0xf   :  { %327 = dma.done.wait [#allocation6], 4608  }
  0x10   :  { %328 = vsyncadd [#allocation6], 4294962688  ;;  %vm100_vm0 = vcmask 64512   ;;  %v63_v0 = vld [vmem:[#allocation5] sm:$0xff]  ;;  %v62_v1 = vld [vmem:[#allocation2] sm:$0xff]  ;;  %v168_v42 = vlaneseq  ;;  %vm195_vm6 = vcmask 39936  }
  0x11   :  { %v79_v2 = vld [vmem:[#allocation5 + $0x80] sm:$0xff]  ;;  %119 = vmatpush.msra.mxu0 %v63_v0  ;;  %v78_v3 = vld [vmem:[#allocation5 + $0x78] sm:$0xff]  ;;  %v77_v4 = vld [vmem:[#allocation5 + $0x70] sm:$0xff] }
  0x12   :  { %126 = vmatpush.msra.mxu1 %v79_v2  ;;  %217 = vmatmul.msk.f32.vlgmr.msra.gmra.mxu0 %vm100_vm0, %v62_v1  ;;  %v76_v5 = vld [vmem:[#allocation5 + $0x68] sm:$0xff]  ;;  %v75_v6 = vld [vmem:[#allocation5 + $0x60] sm:$0xff]  ;;  %v74_v7 = vld [vmem:[#allocation5 + $0x58] sm:$0xff]  ;;  %v169_v43 = vand.u32 127, %v168_v42 }
  0x13   :  { %v73_v8 = vld [vmem:[#allocation5 + $0x50] sm:$0xff]  ;;  %v72_v9 = vld [vmem:[#allocation5 + $0x48] sm:$0xff]  ;;  %v71_v10 = vld [vmem:[#allocation5 + $0x40] sm:$0xff] }
  0x14   :  { %127 = vmatpush.msra.mxu1 %v78_v3  ;;  %v70_v11 = vld [vmem:[#allocation5 + $0x38] sm:$0xff]  ;;  %v69_v12 = vld [vmem:[#allocation5 + $0x30] sm:$0xff]  ;;  %v68_v13 = vld [vmem:[#allocation5 + $0x28] sm:$0xff]  ;;  %vm170_vm1 = vcmp.lt.s32.totalorder %v169_v43, 4  ;;  %vm192_vm5 = vcmp.eq.s32.totalorder %v169_v43, 4 }
  0x15   :  { %v67_v14 = vld [vmem:[#allocation5 + $0x20] sm:$0xff]  ;;  %v66_v15 = vld [vmem:[#allocation5 + $0x18] sm:$0xff]  ;;  %v65_v16 = vld [vmem:[#allocation5 + $0x10] sm:$0xff] }
  0x16   :  { %128 = vmatpush.msra.mxu1 %v77_v4  ;;  %v64_v17 = vld [vmem:[#allocation5 + $0x8] sm:$0xff]  ;;  %v95_v18 = vld [vmem:[#allocation5 + $0x100] sm:$0xff]  ;;  %v94_v19 = vld [vmem:[#allocation5 + $0xf8] sm:$0xff] }
  0x17   :  { %148 = vmatpush.msra.mxu2 %v95_v18  ;;  %v93_v20 = vld [vmem:[#allocation5 + $0xf0] sm:$0xff]  ;;  %v92_v21 = vld [vmem:[#allocation5 + $0xe8] sm:$0xff]  ;;  %v91_v22 = vld [vmem:[#allocation5 + $0xe0] sm:$0xff] }
  0x18   :  { %129 = vmatpush.msra.mxu1 %v76_v5  ;;  %v90_v23 = vld [vmem:[#allocation5 + $0xd8] sm:$0xff]  ;;  %v89_v24 = vld [vmem:[#allocation5 + $0xd0] sm:$0xff]  ;;  %v88_v25 = vld [vmem:[#allocation5 + $0xc8] sm:$0xff] }
  0x19   :  { %149 = vmatpush.msra.mxu2 %v94_v19  ;;  %v87_v26 = vld [vmem:[#allocation5 + $0xc0] sm:$0xff]  ;;  %v86_v27 = vld [vmem:[#allocation5 + $0xb8] sm:$0xff]  ;;  %v85_v28 = vld [vmem:[#allocation5 + $0xb0] sm:$0xff] }
  0x1a   :  { %130 = vmatpush.msra.mxu1 %v75_v6  ;;  %v84_v29 = vld [vmem:[#allocation5 + $0xa8] sm:$0xff]  ;;  %v83_v30 = vld [vmem:[#allocation5 + $0xa0] sm:$0xff]  ;;  %v82_v35 = vld [vmem:[#allocation5 + $0x98] sm:$0xff] }
  0x1b   :  { %150 = vmatpush.msra.mxu2 %v93_v20  ;;  %v226_v31 = vld [vmem:[#allocation7] ss:$0 sm:$0xff]  ;;  %v81_v36 = vld [vmem:[#allocation5 + $0x90] sm:$0xff]  ;;  %v228_v44 = vld [vmem:[#allocation7 + $0x10] ss:$0 sm:$0xff] }
  0x1c   :  { %131 = vmatpush.msra.mxu1 %v74_v7  ;;  %v80_v37 = vld [vmem:[#allocation5 + $0x88] sm:$0xff]  ;;  %v227_v38 = vld [vmem:[#allocation7 + $0x8] ss:$0 sm:$0xff] }
  0x1d   :  { %151 = vmatpush.msra.mxu2 %v92_v21 }
  0x1e   :  { %132 = vmatpush.msra.mxu1 %v73_v8 }
  0x1f   :  { %152 = vmatpush.msra.mxu2 %v91_v22 }
  0x20   :  { %133 = vmatpush.msra.mxu1 %v72_v9 }
  0x21   :  { %153 = vmatpush.msra.mxu2 %v90_v23 }
  0x22   :  { %134 = vmatpush.msra.mxu1 %v71_v10 }
  0x23   :  { %154 = vmatpush.msra.mxu2 %v89_v24 }
  0x24   :  { %135 = vmatpush.msra.mxu1 %v70_v11 }
  0x25   :  { %155 = vmatpush.msra.mxu2 %v88_v25 }
  0x26   :  { %136 = vmatpush.msra.mxu1 %v69_v12 }
  0x27   :  { %156 = vmatpush.msra.mxu2 %v87_v26 }
  0x28   :  { %137 = vmatpush.msra.mxu1 %v68_v13 }
  0x29   :  { %157 = vmatpush.msra.mxu2 %v86_v27 }
  0x2a   :  { %138 = vmatpush.msra.mxu1 %v67_v14 }
  0x2b   :  { %158 = vmatpush.msra.mxu2 %v85_v28 }
  0x2c   :  { %139 = vmatpush.msra.mxu1 %v66_v15 }
  0x2d   :  { %159 = vmatpush.msra.mxu2 %v84_v29 }
  0x2e   :  { %140 = vmatpush.msra.mxu1 %v65_v16 }
  0x2f   :  { %160 = vmatpush.msra.mxu2 %v83_v30 }
  0x30   :  { %141 = vmatpush.msra.mxu1 %v64_v17 }
  0x31   :  { %161 = vmatpush.msra.mxu2 %v82_v35 }
  0x33   :  { %162 = vmatpush.msra.mxu2 %v81_v36 }
  0x35   :  { %163 = vmatpush.msra.mxu2 %v80_v37 }
  0x8f   :  { %v121_v32 = vpop.f32.mrf.mxu0 }
  0x90   :  { %v122_v33 = vadd.f32 %v226_v31, %v121_v32 }
  0x92   :  { %v124_v34 = vmax.f32 %v122_v33, 0.0 }
  0x94   :  { %142 = vmatmul.f32.vlgmr.msra.gmra.mxu1 %v124_v34 }
 0x111   :  { %v143_v39 = vpop.f32.mrf.mxu1 }
 0x112   :  { %v144_v40 = vadd.f32 %v227_v38, %v143_v39 }
 0x114   :  { %v146_v41 = vmax.f32 %v144_v40, 0.0 }
 0x116   :  { %164 = vmatmul.f32.vlgmr.msra.gmra.mxu2 %v146_v41 }
 0x199   :  { %v165_v45 = vpop.f32.mrf.mxu2 }
 0x19a   :  { %v166_v46 = vadd.f32 %v228_v44, %v165_v45 }
 0x19c   :  { %v171_v47 = vsel %vm170_vm1, %v166_v46, -inf }
 0x19d   :  { %172 = vmax.xlane.f32.xlu0 %v171_v47 }
 0x210   :  { %v173_v48 = vpop.xlane.xlu0 %172 }
 0x211   :  { %vm174_vm2 = vcmp.eq.f32.partialorder %v171_v47, %v173_v48 }
 0x212   :  { %v175_v49 = vsel %vm174_vm2, %v169_v43, 128 }
 0x213   :  { %v177_v50 = vshra.s32 %v175_v49, 16  ;;  %v176_v52 = vand.u32 65535, %v175_v49 }
 0x215   :  { %v179_v51 = vcvt.s32.f32 %v177_v50  ;;  %v178_v54 = vcvt.s32.f32 %v176_v52 }
 0x217   :  { %180 = vmin.xlane.f32.xlu0 %v179_v51 }
 0x28a   :  { %v181_v53 = vpop.xlane.xlu0 %180 }
 0x28b   :  { %vm182_vm3 = vcmp.eq.f32.partialorder %v179_v51, %v181_v53  ;;  %v187_v56 = vcvt.f32.s32 %v181_v53 }
 0x28c   :  { %v183_v55 = vsel %vm182_vm3, %v178_v54, inf }
 0x28d   :  { %184 = vmin.xlane.f32.xlu1 %v183_v55  ;;  %v188_v58 = vshll.u32 %v187_v56, 16 }
 0x300   :  { %v185_v57 = vpop.xlane.xlu1 %184 }
 0x301   :  { %v186_v59 = vcvt.f32.s32 %v185_v57 }
 0x303   :  { %v189_v60 = vadd.s32 %v188_v58, %v186_v59 }
 0x305   :  { %vm190_vm4 = vcmp.lt.s32.totalorder %v189_v60, 3 }
 0x306   :  { %v191_v61 = vsel %vm190_vm4, %v189_v60, 3 }
 0x307   :  { %v193_v62 = vcvt.s32.f32 %v191_v61 }
 0x309   :  { %v194_v63 = vsel %vm192_vm5, %v193_v62, %v166_v46 }
 0x30a   :  { %196 = vst.msk [vmem:[#allocation8] sm:$0xff] %vm195_vm6, %v194_v63 }
 0x30b   :  { %200 = vsyncadd [#allocation4], 96  ;;  %s203_s30 = sshll.u32 %s380_s3, 4  ;;  %s338_s4 = smov [#allocation8]   ;;  %s204_s30 = int_to_ptr.hbm [resolvable:$true] %s203_s30 }
 0x30c   :  { %s201_s5 = sshll.u32 %s338_s4, 4  ;;  %s202_s5 = int_to_ptr.vmem [resolvable:$true] %s201_s5 }
 0x30d   :  { %209 = dma.vmem_to_hbm [thread:$0]  %s202_s5, 32, %s204_s30, [#allocation4], %s335_s24, %s335_s24, %s336_s25  }
 0x30e   :  { %329 = dma.done.wait [#allocation4], 128  }
 0x30f   :  { %330 = vsyncadd [#allocation4], 4294967168 }
 0x310   :  { %214 = vsyncpa [#allocation3], 1 }
 0x311   :  { %215 = vsyncpa [#allocation6], 1 }
 0x312   :  { %216 = vsyncpa [#allocation4], 1 }

</bundles_post_ra>
